<compile_context>
chip_gen: v7x
topology: tpu7x:2x2x1
jax: 0.10.0
libtpu: 0.0.40
codegen_flags: <defaults>
</compile_context>

<pallas_src>
import jax
import jax.numpy as jnp
from jax.experimental import pallas as pl
from jax.experimental.pallas import tpu as pltpu


def _srfe_kernel(x_ref, w_ref, b_ref, o_ref):
    # x_ref: (t_seq, in_dim) VMEM      w_ref: (in_dim, n_head) VMEM
    # b_ref: (1,) SMEM scalar          o_ref: (n_head, t_seq) VMEM
    acc = jnp.dot(x_ref[...], w_ref[...], preferred_element_type=jnp.float32)
    acc = acc + b_ref[0]
    # Fused output transpose (rides the XLU slot) -> lane-dense store.
    o_ref[...] = jnp.transpose(acc).astype(o_ref.dtype)


def _tile_target_bytes():
    """Per-input-buffer tile budget, by TPU generation (double-buffered)."""
    try:
        kind = jax.devices()[0].device_kind.lower()
    except Exception:
        kind = ""
    if any(g in kind for g in ("v2", "v3", "v4", "v5")):
        # Slower HBM (<=~0.8 TB/s): an 8 MiB tile is already ~10 us of DMA,
        # so the ~0.35 us/step pipeline overhead is <4%.
        return 8 * 1024 * 1024
    # v6e / v7x and newer (1.4 / 3.2 TB/s): bigger tiles to amortize the
    # fixed per-step cost; 2 x 16 MiB input buffers stay under 48 MiB.
    return 16 * 1024 * 1024


def _pick_seq_tile(seq, row_bytes, target_bytes):
    """Sequence rows per grid step, sized purely by bytes (no row cap).

    When tiling (t < seq) the tile is a multiple of 128 so the transposed
    output block is lane-dense; that also satisfies the multiple-of-8
    sublane requirement on the input block.
    """
    t = max(1, target_bytes // max(row_bytes, 1))
    if t >= seq:
        return seq  # single block spanning the whole sequence (full dim ok)
    t = max(128, (t // 128) * 128)
    return seq if t >= seq else t


def _build_block_diag_weight(weight, n_head, dtype):
    """w_bd[h*d + j, h] = W[0, j]  ->  (in_dim, n_head).

    Cast to the activation dtype (if x is bf16 this truncates the f32 Linear
    weight slightly vs PyTorch; acceptable, MXU-friendly). Construct once per
    weight / let jit constant-fold; it is tiny.
    """
    d = weight.shape[-1]
    w = weight.reshape(d).astype(dtype)
    eye = jnp.eye(n_head, dtype=dtype)
    return (eye[:, None, :] * w[None, :, None]).reshape(n_head * d, n_head)


def memory_srfe(x, weight, bias, n_head):
    """x: (bs, seq, in_dim); weight: (1, in_dim//n_head); bias: (1,)."""
    bs, seq, in_dim = x.shape
    assert in_dim % n_head == 0

    itemsize = jnp.dtype(x.dtype).itemsize
    t_seq = _pick_seq_tile(seq, in_dim * itemsize, _tile_target_bytes())
    grid = (bs, pl.cdiv(seq, t_seq))

    w_bd = _build_block_diag_weight(weight, n_head, x.dtype)
    b = bias.reshape(1).astype(jnp.float32)  # scalar -> SMEM

    out = pl.pallas_call(
        _srfe_kernel,
        out_shape=jax.ShapeDtypeStruct((bs, n_head, seq), x.dtype),
        grid=grid,
        in_specs=[
            # x: native layout, batch dim squeezed, lane-dense reads.
            pl.BlockSpec((None, t_seq, in_dim), lambda b_, i: (b_, i, 0)),
            # tiny block-diagonal weight, same block every step.
            pl.BlockSpec((in_dim, n_head), lambda b_, i: (0, 0)),
            # bias scalar in SMEM.
            pl.BlockSpec(memory_space=pltpu.MemorySpace.SMEM),
        ],
        # transposed, lane-dense output block (n_head, t_seq).
        out_specs=pl.BlockSpec((None, n_head, t_seq), lambda b_, i: (b_, 0, i)),
        compiler_params=pltpu.CompilerParams(
            dimension_semantics=("parallel", "parallel"),
            vmem_limit_bytes=48 * 1024 * 1024,
        ),
        cost_estimate=pl.CostEstimate(
            flops=2 * bs * seq * in_dim,
            transcendentals=0,
            bytes_accessed=(bs * seq * in_dim * itemsize
                            + bs * seq * n_head * itemsize
                            + in_dim * n_head * itemsize),
        ),
    )(x, w_bd, b)

    # (bs, n_head, seq) -> (bs, n_head, seq, 1): free reshape, no transpose.
    return out[..., None]


if __name__ == "__main__":
    # small shapes consistent with the module
    bs, seq, in_dim, n_head = 2, 8, 32, 4
    d = in_dim // n_head

    key = jax.random.PRNGKey(0)
    kx, kw, kb = jax.random.split(key, 3)

    x = jax.random.normal(kx, (bs, seq, in_dim), dtype=jnp.float32)
    # deterministic init of nn.Linear(d, 1) parameters (uniform like torch default)
    bound = 1.0 / (d ** 0.5)
    weight = jax.random.uniform(kw, (1, d), minval=-bound, maxval=bound,
                                dtype=jnp.float32)
    bias = jax.random.uniform(kb, (1,), minval=-bound, maxval=bound,
                              dtype=jnp.float32)

    y = memory_srfe(x, weight, bias, n_head)
    y = jax.block_until_ready(y)

    # reference check in plain JAX (same math as the PyTorch forward)
    x4 = x.reshape(bs, seq, n_head, d).transpose(0, 2, 1, 3)
    y_ref = x4 @ weight.T + bias  # (bs, H, seq, 1)
    assert y.shape == (bs, n_head, seq, 1), y.shape
    assert jnp.allclose(y, y_ref, atol=1e-5, rtol=1e-5)

    print("KERNEL_OK")
</pallas_src>

<mosaic_0001>
module attributes {stable_mosaic.version = 11 : i64} {
  func.func @_srfe_kernel(%arg0: i32, %arg1: i32, %arg2: memref<1x8x32xf32, #tpu.memory_space<vmem>>, %arg3: memref<32x4xf32, #tpu.memory_space<vmem>>, %arg4: memref<1xf32, #tpu.memory_space<smem>>, %arg5: memref<1x4x8xf32, #tpu.memory_space<vmem>>) attributes {dimension_semantics = [#tpu.dimension_semantics<parallel>, #tpu.dimension_semantics<parallel>], iteration_bounds = array<i64: 2, 1>, scalar_prefetch = 0 : i64, scratch_operands = 0 : i64, tpu.core_type = #tpu.core_type<tc>, window_params = [{transform_indices = @transform_0, window_bounds = array<i64: 1, 8, 32>}, {pipeline_mode = #tpu.pipeline_mode<synchronous>, transform_indices = @transform_1, window_bounds = array<i64: 32, 4>}, {transform_indices = @transform_2, window_bounds = array<i64: 1>}, {transform_indices = @transform_3, window_bounds = array<i64: 1, 4, 8>}]} {
    %c0 = arith.constant 0 : index
    %c0_0 = arith.constant 0 : index
    %c0_1 = arith.constant 0 : index
    %0 = vector.load %arg2[%c0, %c0_0, %c0_1] : memref<1x8x32xf32, #tpu.memory_space<vmem>>, vector<1x8x32xf32>
    %1 = vector.shape_cast %0 : vector<1x8x32xf32> to vector<8x32xf32>
    %c0_2 = arith.constant 0 : index
    %c0_3 = arith.constant 0 : index
    %2 = vector.load %arg3[%c0_2, %c0_3] : memref<32x4xf32, #tpu.memory_space<vmem>>, vector<32x4xf32>
    %cst = arith.constant dense<0.000000e+00> : vector<8x4xf32>
    %3 = tpu.matmul %1, %2, %cst {dimension_numbers = #tpu.dot_dimension_numbers<[1], [0], [0], [1], [0, 0, 1, 1], [], []>} : vector<8x32xf32>, vector<32x4xf32>, vector<8x4xf32> -> vector<8x4xf32>
    %c0_4 = arith.constant 0 : index
    %4 = memref.load %arg4[%c0_4] : memref<1xf32, #tpu.memory_space<smem>>
    %5 = vector.broadcast %4 : f32 to vector<8x4xf32>
    %6 = arith.addf %3, %5 : vector<8x4xf32>
    %7 = tpu.transpose %6, [1, 0] : vector<8x4xf32> -> vector<4x8xf32>
    %c0_5 = arith.constant 0 : index
    %c0_6 = arith.constant 0 : index
    %c0_7 = arith.constant 0 : index
    %8 = vector.load %arg5[%c0_5, %c0_6, %c0_7] : memref<1x4x8xf32, #tpu.memory_space<vmem>>, vector<1x4x8xf32>
    %9 = vector.shape_cast %8 : vector<1x4x8xf32> to vector<4x8xf32>
    %10 = vector.shape_cast %7 : vector<4x8xf32> to vector<1x4x8xf32>
    tpu.vector_store %arg5[%c0_5, %c0_6, %c0_7], %10 {strides = array<i32>} : memref<1x4x8xf32, #tpu.memory_space<vmem>>, vector<1x4x8xf32>,
    return
  }
  func.func @transform_0(%arg0: i32, %arg1: i32) -> (i32, i32, i32) {
    %c0_i32 = arith.constant 0 : i32
    %c0_i32_0 = arith.constant 0 : i32
    return %arg0, %arg1, %c0_i32 : i32, i32, i32
  }
  func.func @transform_1(%arg0: i32, %arg1: i32) -> (i32, i32) {
    %c0_i32 = arith.constant 0 : i32
    %c0_i32_0 = arith.constant 0 : i32
    %c0_i32_1 = arith.constant 0 : i32
    return %c0_i32, %c0_i32_0 : i32, i32
  }
  func.func @transform_2(%arg0: i32, %arg1: i32) -> i32 {
    %c0_i32 = arith.constant 0 : i32
    %c0_i32_0 = arith.constant 0 : i32
    return %c0_i32 : i32
  }
  func.func @transform_3(%arg0: i32, %arg1: i32) -> (i32, i32, i32) {
    %c0_i32 = arith.constant 0 : i32
    %c0_i32_0 = arith.constant 0 : i32
    return %arg0, %c0_i32, %arg1 : i32, i32, i32
  }
}

</mosaic_0001>

<bundles_post_ra>
// kernel: tpu_custom_call.1
= control target key start
LH: loop header
LB: loop body
LE: loop exit
PB: predicated region body
PF: predicated region fallthrough
CT: control target
= control target key end

     0   :  { %s716_s0 = inlined_call_operand.vmem [shape: f32[2,8,32], index: 0, kind: input, shape index: {}]   ;;  %s717_s1 = inlined_call_operand.vmem [shape: f32[32,4], index: 1, kind: input, shape index: {}]   ;;  %s718_s2 = inlined_call_operand.<no memory space> [shape: f32[1], index: 2, kind: input, shape index: {}]   ;;  %s719_s3 = inlined_call_operand.hbm [shape: f32[2,4,8], index: 3, kind: output, shape index: {}]  }
   0x1   :  { %8 = sst [smem:[#allocation2]] %s718_s2 }
   0x2   :  { %9 = vsyncpa [#allocation4], 0 }
   0x3   :  { %11 = vsyncpa [#allocation4 + $0x1], 0  ;;  %s592_s14 = smov 0   ;;  %s594_s15 = smov 0  }
   0x4   :  { %s596_s16 = smov 0   ;;  %s598_s17 = smov 0  }
   0x5   :  { %s600_s18 = smov 0   ;;  %s602_s19 = smov 0  }
   0x6 LB: > { %s393_s2 = sadd.s32 4294967295, %s563_s19   ;;  %s394_s20 = sadd.s32 4294967294, %s563_s19   ;;  %s563_s19 = sphi %s602_s19, %s17_s19   ;;  %s559_s18 = sphi %s600_s18, %s726_s18   ;;  %s555_s17 = sphi %s598_s17, %s725_s17   ;;  %s551_s16 = sphi %s596_s16, %s724_s16   ;;  %s547_s15 = sphi %s594_s15, %s723_s15   ;;  %s543_s14 = sphi %s592_s14, %s722_s14  }
   0x7   : > { %s29_s21 = sadd.s32 1, %s559_s18  ;;  %s108_s22 = sadd.s32 1, %s551_s16 }
   0x8   : > { %p31_p0 = scmp.ge.s32.totalorder %s29_s21, 2  ;;  %p118_p1 = scmp.ne.s32.totalorder %s551_s16, %s547_s15 }
   0x9   : > { %p119_p2 = scmp.eq.s32.totalorder %s393_s2, 1  ;;  %p124_p3 = scmp.ne.s32.totalorder %s547_s15, %s543_s14 }
   0xa   : > { %s728_s21 = smov (%p31_p0, %s29_s21), 0  ;;  %p125_p5 = scmp.eq.s32.totalorder %s394_s20, 1 }
   0xb   : > { %p632_p4 = por %p119_p2, %p118_p1  ;;  %s103_s24 = ssub.s32 %s559_s18, %s728_s21 }
   0xc   : > { %p397_p6 = scmp.ge.s32.totalorder %s563_s19, 1  ;;  %p106_p7 = scmp.eq.s32.totalorder %s103_s24, 0 }
   0xd   : > { %p639_p8 = por %p125_p5, %p124_p3  ;;  %p159_p9 = scmp.lt.s32.totalorder %s563_s19, 3 }
   0xe   : > { %s645_s26 = scalar_select %p106_p7, %s551_s16, %s108_s22  }
   0xf   : > { %p160_p10 = pnand %p397_p6, %p159_p9 }
  0x10   : > { %v193_v0 = vld [vmem:[%s717_s1] sm:$0xff] (!%p160_p10)  ;;  %v194_v1 = vld [vmem:[%s717_s1 + $0x8] sm:$0xff] (!%p160_p10)  ;;  %v195_v2 = vld [vmem:[%s717_s1 + $0x10] sm:$0xff] (!%p160_p10)  ;;  %v565_v3 = vmov (!%p160_p10), 0.0|0.0   ;;  %vm566_vm0 = vmmov (!%p160_p10), 0   ;;  %v567_v6 = vmov (!%p160_p10), 0.0  }
  0x11   : > { %163 = sbr.rel (%p160_p10) target bundleno = 386 (0x182), region = 32  ;;  %421 = vmatprep.subr.bf16.mxu0 (!%p160_p10), %v565_v3  ;;  %v422_v4 = vpack.c.bf16 (!%p160_p10), %v194_v1, %v193_v0  ;;  %v196_v5 = vld [vmem:[%s717_s1 + $0x18] sm:$0xff] (!%p160_p10)  ;;  %418 = vmatprep.mubr.msk.f32.mxu0 (!%p160_p10), %vm566_vm0, %v567_v6  ;;  %p185_p11 = scmp.lt.s32.totalorder (!%p160_p10), %s555_s17, 1  ;;  %vm199_vm1 = vcmask (!%p160_p10), 261120   ;;  %vm305_vm2 = vcmask (!%p160_p10), 60416  }
  0x12   : > { %v425_v7 = vpack.c.bf16 (!%p160_p10), %v196_v5, %v195_v2  ;;  %s197_s13 = sld [smem:[#allocation2]] (!%p160_p10)  ;;  %s182_s2 = sand.u32 (!%p160_p10), 1, %s547_s15  }
  0x13   : > { %423 = vmatpush3.bf16.msra.mxu0 (!%p160_p10), %v422_v4  ;;  %s398_s20 = sshll.u32 (!%p160_p10), %s182_s2, 2  ;;  %s402_s22 = sshll.u32 (!%p160_p10), %s555_s17, 6 }
  0x14   : > { %424 = vmatprep.subr.bf16.mxu0 (!%p160_p10), %v565_v3  ;;  %s184_s24 = scalar_lea.vmem (!%p160_p10), [#allocation3], %s398_s20  ;;  %s669_s30 = scalar_lea.hbm (!%p160_p10), %s719_s3, %s402_s22 }
  0x15   : > { %s322_s27 = sshll.u32 (!%p160_p10), %s184_s24, 4  ;;  %s308_s4 = scalar_lea.sflag (!%p160_p10), [#allocation4], %s182_s2  ;;  %s671_s27 = int_to_ptr.vmem [resolvable:$true] %s322_s27 }
  0x16   : > { %s485_s5 = scalar_lea.vmem (!%p160_p10), %s671_s27, 64 }
  0x17   : > { %426 = vmatpush3.bf16.msra.mxu0 (!%p160_p10), %v425_v7  ;;  %p486_p12 = scmp.ne.s32.totalorder (!%p160_p10), %s671_s27, %s485_s5 }
  0x18   : > { %s186_s8 = scalar_select %p185_p11, %s555_s17, 1  ;;  %v198_v9 = vstv %s197_s13 }
  0x19   : > { %p487_p13 = pnand %p486_p12, %p632_p4  ;;  %s568_s17 = smov [#allocation3]  }
  0x1a   : > { %s399_s9 = sshll.u32 %s186_s8, 3  ;;  %s489_s6 = sshll.u32 %s568_s17, 4  ;;  %s490_s6 = int_to_ptr.vmem [resolvable:$false] %s489_s6 }
  0x1b   : > { %s191_s12 = scalar_lea.vmem %s716_s0, %s399_s9  ;;  %p488_p0 = pneg %p487_p13 }
  0x1c   : > { %v192_v8 = vld [vmem:[%s191_s12] sm:$0xff]  ;;  %s491_s7 = scalar_lea.vmem %s490_s6, 128  ;;  %p492_p1 = scmp.lt.s32.totalorder %s671_s27, %s490_s6 }
  0x1d   : > { %419 = vmatmul.mubr.msk.f32.vlgmr.msra.gmra.mrb[0].mxu0 %vm199_vm1, %v192_v8  ;;  %p493_p2 = scmp.lt.s32.totalorder %s491_s7, %s485_s5 }
  0x1f   : > { %p494_p3 = por %p493_p2, %p492_p1 }
  0x21   : > { %p495_p5 = pnand %p494_p3, %p488_p0 }
  0xf0   : > { %v269_v10 = vpop.f32.mrb[0].mxu0 }
  0xf1   : > { %v420_v11 = vpop.f32.mrb[1].mxu0  ;;  %v270_v12 = vadd.f32 %v269_v10, %v198_v9 }
  0xf3   : > { %273 = vxpose.xlu0.b32.start.end [1/1] (short) (narrow) %v270_v12, 8 }
 0x173   : > { %v289_v13 = vpop.trf.xlu0 }
 0x174   : > { %306 = vst.msk [vmem:[%s184_s24] sm:$0xf] %vm305_vm2, %v289_v13 }
 0x175   : > { %498 = shalt.err (!%p495_p5)
}
 0x176   : > { %s499_s8 = scalar_lea.hbm %s669_s30, 64  ;;  %s503_s11 = scalar_lea.hbm %s719_s3, 128 }
 0x177   : > { %p500_p6 = scmp.ne.s32.totalorder %s669_s30, %s499_s8  ;;  %p504_p10 = scmp.lt.u32.totalorder %s669_s30, %s719_s3 }
 0x178   : > { %p505_p11 = scmp.lt.u32.totalorder %s503_s11, %s499_s8  ;;  %p507_p13 = scmp.lt.u32.totalorder %s499_s8, %s669_s30 }
 0x179   : > { %p501_p7 = pnand %p500_p6, %p632_p4 }
 0x17a   : > { %p506_p12 = por %p505_p11, %p504_p10 }
 0x17b   : > { %p502_p9 = pneg %p501_p7 }
 0x17c   : > { %p508_p0 = por %p507_p13, %p506_p12 }
 0x17e   : > { %p509_p1 = pnand %p508_p0, %p502_p9 }
 0x180   : > { %512 = shalt.err (!%p509_p1)
}
 0x181   : > { %427 = dma.vmem_to_hbm [thread:$0]  (%p632_p4), %s671_s27, 64, %s669_s30, %s308_s4  }
 0x182 PF: > { %p433_p2 = scmp.ge.s32.totalorder %s563_s19, 2  ;;  %s334_s2 = sand.u32 1, %s543_s14  }
 0x183   : > { %s335_s20 = scalar_lea.sflag [#allocation4], %s334_s2 }
 0x184   : > { %p430_p3 = pnand %p433_p2, %p639_p8 }
 0x186   : > { %538 = dma.done.wait (!%p430_p3), %s335_s20, 64  }
 0x187   : > { %540 = vsyncadd (!%p430_p3), %s335_s20, 4294967232  ;;  %s17_s19 = sadd.s32 1, %s563_s19   ;;  %s722_s14 = smov %s547_s15 }
 0x188   : > { %p14_p5 = scmp.ge.s32.totalorder %s17_s19, 4   ;;  %s723_s15 = smov %s551_s16 }
 0x189   : > { %s724_s16 = smov %s645_s26  ;;  %s725_s17 = smov %s559_s18 }
 0x18a   : > { %s726_s18 = smov %s728_s21  ;;  %16 = sbr.rel (!%p14_p5) target bundleno = 6 (0x6), region = 67 }
 0x191   :  { %340 = vsyncpa [#allocation4], 1 }
 0x192   :  { %342 = vsyncpa [#allocation4 + $0x1], 1 }

</bundles_post_ra>
